<compile_context>
chip_gen: v5e
topology: v5e:2x2
jax: 0.10.0
libtpu: 0.0.40
codegen_flags: <defaults>
</compile_context>

<pallas_src>
import jax
import jax.numpy as jnp
from jax import lax
from jax.experimental import pallas as pl
from jax.experimental.pallas import tpu as pltpu

INPUT_SIZE = 203
HIDDEN_SIZE = 128
OUTPUT_SIZE = 3


def _round_up(n, m):
    return ((n + m - 1) // m) * m


def kalmannet_kernel(x_ref, w1_ref, b1_ref, w2_ref, b2_ref, w3t_ref, b3_ref, o_ref):
    # In-kernel cast: x is streamed f32 (saves a wrapper-side HBM cast pass),
    # MXU inputs are bf16 with f32 accumulation.
    x = x_ref[...].astype(jnp.bfloat16)

    # Layer 1: (tb, 203) @ (203, 128) -> f32, + bias, ReLU
    h1 = jnp.dot(x, w1_ref[...], preferred_element_type=jnp.float32)
    h1 = jnp.maximum(h1 + b1_ref[...], 0.0)

    # Layer 2: (tb, 128) @ (128, 128) -> f32, + bias, ReLU
    h2 = jnp.dot(h1.astype(jnp.bfloat16), w2_ref[...],
                 preferred_element_type=jnp.float32)
    h2 = jnp.maximum(h2 + b2_ref[...], 0.0)

    # Layer 3 computed transposed so the store is lane-dense (batch on the
    # 128-lane axis). Contract axis 1 of both operands so no separate vxpose
    # pass is needed: (3,128) . (tb,128) -> (3, tb).
    h3_t = lax.dot_general(
        w3t_ref[...], h2.astype(jnp.bfloat16),
        dimension_numbers=(((1,), (1,)), ((), ())),
        preferred_element_type=jnp.float32)

    # Final ReLU matches the reference module's trailing torch.relu(x).
    o_ref[...] = jnp.maximum(h3_t + b3_ref[...], 0.0).astype(o_ref.dtype)


def _choose_tiling(B, tile_b):
    """Pick a 128-multiple batch block and padded batch.

    Keeps the grid >= 2 steps whenever the (128-rounded) batch allows it so
    the 'parallel' grid axis can be sharded across both v7x TensorCores."""
    tile_b = max(128, _round_up(tile_b, 128))
    B128 = _round_up(max(B, 1), 128)
    if B128 <= tile_b:
        block_b = max(128, _round_up(pl.cdiv(B128, 2), 128))
    else:
        block_b = tile_b
    B_pad = _round_up(B128, block_b)
    return block_b, B_pad


def kalmannet_forward(x, params, *, tile_b=2048):
    """x: (B, INPUT_SIZE) float32. Returns (B, OUTPUT_SIZE) float32."""
    w1, b1, w2, b2, w3, b3 = params
    B = x.shape[0]

    block_b, B_pad = _choose_tiling(B, tile_b)

    # Pad only when the batch is not already tile-aligned (no wrapper dtype
    # cast of x: the bf16 cast happens inside the kernel).
    if B_pad != B:
        x = jnp.pad(x, ((0, B_pad - B), (0, 0)))

    # Resident bf16 weights (~85 KB total); f32 biases.
    w1b = w1.astype(jnp.bfloat16)                       # (203, 128)
    w2b = w2.astype(jnp.bfloat16)                       # (128, 128)
    w3t = w3.T.astype(jnp.bfloat16)                     # (3, 128)
    b3t = b3.reshape(OUTPUT_SIZE, 1)                    # (3, 1)

    grid = (B_pad // block_b,)
    full = lambda a: pl.BlockSpec(a.shape, lambda i: (0, 0))

    flops = 2 * B_pad * (INPUT_SIZE * HIDDEN_SIZE
                         + HIDDEN_SIZE * HIDDEN_SIZE
                         + HIDDEN_SIZE * OUTPUT_SIZE)
    weight_bytes = (w1b.size + w2b.size + w3t.size) * 2 \
        + (b1.size + b2.size + b3t.size) * 4
    bytes_accessed = B_pad * (INPUT_SIZE * 4 + OUTPUT_SIZE * 4) + weight_bytes

    out_t = pl.pallas_call(
        kalmannet_kernel,
        out_shape=jax.ShapeDtypeStruct((OUTPUT_SIZE, B_pad), jnp.float32),
        grid_spec=pltpu.PrefetchScalarGridSpec(
            num_scalar_prefetch=0,
            grid=grid,
            in_specs=[
                pl.BlockSpec((block_b, INPUT_SIZE), lambda i: (i, 0)),  # x tile
                full(w1b), full(b1),
                full(w2b), full(b2),
                full(w3t), full(b3t),
            ],
            # (3, block_b): batch on the 128-lane axis -> unmasked stores.
            out_specs=pl.BlockSpec((OUTPUT_SIZE, block_b), lambda i: (0, i)),
        ),
        compiler_params=pltpu.CompilerParams(
            dimension_semantics=("parallel",),
        ),
        cost_estimate=pl.CostEstimate(
            flops=flops, transcendentals=0, bytes_accessed=bytes_accessed),
    )(x, w1b, b1, w2b, b2, w3t, b3t)

    # Undo the in-kernel transpose and drop batch padding.
    return out_t[:, :B].T


def init_params(key):
    """PyTorch nn.Linear-style init (U[-1/sqrt(fan_in), 1/sqrt(fan_in)]).
    Weights stored as (in, out), i.e. transposed vs torch's (out, in)."""
    ks = jax.random.split(key, 6)

    def linear(kw, kb, fan_in, fan_out):
        bound = 1.0 / jnp.sqrt(fan_in)
        w = jax.random.uniform(kw, (fan_in, fan_out), jnp.float32, -bound, bound)
        b = jax.random.uniform(kb, (1, fan_out), jnp.float32, -bound, bound)
        return w, b

    w1, b1 = linear(ks[0], ks[1], INPUT_SIZE, HIDDEN_SIZE)
    w2, b2 = linear(ks[2], ks[3], HIDDEN_SIZE, HIDDEN_SIZE)
    w3, b3 = linear(ks[4], ks[5], HIDDEN_SIZE, OUTPUT_SIZE)
    return (w1, b1, w2, b2, w3, b3)


def reference_forward(x, params):
    """Pure-JAX reference emulating the kernel's bf16 matmul inputs / f32 accum.
    NOTE: a true f32 reference differs by ~bf16 rounding (~1e-2 rel)."""
    w1, b1, w2, b2, w3, b3 = params
    bf = lambda a: a.astype(jnp.bfloat16).astype(jnp.float32)
    h = jnp.maximum(bf(x) @ bf(w1) + b1, 0.0)
    h = jnp.maximum(bf(h) @ bf(w2) + b2, 0.0)
    return jnp.maximum(bf(h) @ bf(w3) + b3, 0.0)


if __name__ == "__main__":
    key = jax.random.PRNGKey(0)
    k_param, k_x = jax.random.split(key)

    params = init_params(k_param)

    batch = 16  # small batch: padded to one 128-row tile, single grid step
    x = jax.random.normal(k_x, (batch, INPUT_SIZE), jnp.float32)

    out = kalmannet_forward(x, params)
    out = jax.block_until_ready(out)

    ref = reference_forward(x, params)
    assert out.shape == (batch, OUTPUT_SIZE)
    assert jnp.allclose(out, ref, atol=1e-2, rtol=1e-2), "mismatch vs reference"

    # Also exercise the multi-step (>=2 grid blocks) path used on v7x.
    x2 = jax.random.normal(k_x, (300, INPUT_SIZE), jnp.float32)
    out2 = jax.block_until_ready(kalmannet_forward(x2, params))
    ref2 = reference_forward(x2, params)
    assert out2.shape == (300, OUTPUT_SIZE)
    assert jnp.allclose(out2, ref2, atol=1e-2, rtol=1e-2), "mismatch (multi-tile)"

    print("KERNEL_OK")
</pallas_src>

<mosaic_0001>
module attributes {stable_mosaic.version = 11 : i64} {
  func.func @kalmannet_kernel(%arg0: i32, %arg1: memref<128x203xf32, #tpu.memory_space<vmem>>, %arg2: memref<203x128xbf16, #tpu.memory_space<vmem>>, %arg3: memref<1x128xf32, #tpu.memory_space<vmem>>, %arg4: memref<128x128xbf16, #tpu.memory_space<vmem>>, %arg5: memref<1x128xf32, #tpu.memory_space<vmem>>, %arg6: memref<3x128xbf16, #tpu.memory_space<vmem>>, %arg7: memref<3x1xf32, #tpu.memory_space<vmem>>, %arg8: memref<3x128xf32, #tpu.memory_space<vmem>>) attributes {dimension_semantics = [#tpu.dimension_semantics<parallel>], iteration_bounds = array<i64: 1>, scalar_prefetch = 0 : i64, scratch_operands = 0 : i64, tpu.core_type = #tpu.core_type<tc>, window_params = [{transform_indices = @transform_0, window_bounds = array<i64: 128, 203>}, {pipeline_mode = #tpu.pipeline_mode<synchronous>, transform_indices = @transform_1, window_bounds = array<i64: 203, 128>}, {pipeline_mode = #tpu.pipeline_mode<synchronous>, transform_indices = @transform_2, window_bounds = array<i64: 1, 128>}, {pipeline_mode = #tpu.pipeline_mode<synchronous>, transform_indices = @transform_3, window_bounds = array<i64: 128, 128>}, {pipeline_mode = #tpu.pipeline_mode<synchronous>, transform_indices = @transform_4, window_bounds = array<i64: 1, 128>}, {pipeline_mode = #tpu.pipeline_mode<synchronous>, transform_indices = @transform_5, window_bounds = array<i64: 3, 128>}, {pipeline_mode = #tpu.pipeline_mode<synchronous>, transform_indices = @transform_6, window_bounds = array<i64: 3, 1>}, {transform_indices = @transform_7, window_bounds = array<i64: 3, 128>}]} {
    %c0 = arith.constant 0 : index
    %c0_0 = arith.constant 0 : index
    %0 = vector.load %arg1[%c0, %c0_0] : memref<128x203xf32, #tpu.memory_space<vmem>>, vector<128x203xf32>
    %1 = arith.truncf %0 : vector<128x203xf32> to vector<128x203xbf16>
    %c0_1 = arith.constant 0 : index
    %c0_2 = arith.constant 0 : index
    %2 = vector.load %arg2[%c0_1, %c0_2] : memref<203x128xbf16, #tpu.memory_space<vmem>>, vector<203x128xbf16>
    %cst = arith.constant dense<0.000000e+00> : vector<128x128xf32>
    %3 = tpu.matmul %1, %2, %cst {dimension_numbers = #tpu.dot_dimension_numbers<[1], [0], [0], [1], [0, 0, 1, 1], [], []>} : vector<128x203xbf16>, vector<203x128xbf16>, vector<128x128xf32> -> vector<128x128xf32>
    %c0_3 = arith.constant 0 : index
    %c0_4 = arith.constant 0 : index
    %4 = vector.load %arg3[%c0_3, %c0_4] : memref<1x128xf32, #tpu.memory_space<vmem>>, vector<1x128xf32>
    %5 = vector.broadcast %4 : vector<1x128xf32> to vector<128x128xf32>
    %6 = arith.addf %3, %5 : vector<128x128xf32>
    %cst_5 = arith.constant 0.000000e+00 : f32
    %7 = vector.broadcast %cst_5 : f32 to vector<128x128xf32>
    %8 = arith.maximumf %6, %7 : vector<128x128xf32>
    %9 = arith.truncf %8 : vector<128x128xf32> to vector<128x128xbf16>
    %c0_6 = arith.constant 0 : index
    %c0_7 = arith.constant 0 : index
    %10 = vector.load %arg4[%c0_6, %c0_7] : memref<128x128xbf16, #tpu.memory_space<vmem>>, vector<128x128xbf16>
    %cst_8 = arith.constant dense<0.000000e+00> : vector<128x128xf32>
    %11 = tpu.matmul %9, %10, %cst_8 {dimension_numbers = #tpu.dot_dimension_numbers<[1], [0], [0], [1], [0, 0, 1, 1], [], []>} : vector<128x128xbf16>, vector<128x128xbf16>, vector<128x128xf32> -> vector<128x128xf32>
    %c0_9 = arith.constant 0 : index
    %c0_10 = arith.constant 0 : index
    %12 = vector.load %arg5[%c0_9, %c0_10] : memref<1x128xf32, #tpu.memory_space<vmem>>, vector<1x128xf32>
    %13 = vector.broadcast %12 : vector<1x128xf32> to vector<128x128xf32>
    %14 = arith.addf %11, %13 : vector<128x128xf32>
    %cst_11 = arith.constant 0.000000e+00 : f32
    %15 = vector.broadcast %cst_11 : f32 to vector<128x128xf32>
    %16 = arith.maximumf %14, %15 : vector<128x128xf32>
    %c0_12 = arith.constant 0 : index
    %c0_13 = arith.constant 0 : index
    %17 = vector.load %arg6[%c0_12, %c0_13] : memref<3x128xbf16, #tpu.memory_space<vmem>>, vector<3x128xbf16>
    %18 = arith.truncf %16 : vector<128x128xf32> to vector<128x128xbf16>
    %cst_14 = arith.constant dense<0.000000e+00> : vector<3x128xf32>
    %19 = tpu.matmul %17, %18, %cst_14 {dimension_numbers = #tpu.dot_dimension_numbers<[1], [1], [0], [0], [0, 0, 1, 0], [], []>} : vector<3x128xbf16>, vector<128x128xbf16>, vector<3x128xf32> -> vector<3x128xf32>
    %c0_15 = arith.constant 0 : index
    %c0_16 = arith.constant 0 : index
    %20 = vector.load %arg7[%c0_15, %c0_16] : memref<3x1xf32, #tpu.memory_space<vmem>>, vector<3x1xf32>
    %21 = vector.broadcast %20 : vector<3x1xf32> to vector<3x128xf32>
    %22 = arith.addf %19, %21 : vector<3x128xf32>
    %cst_17 = arith.constant 0.000000e+00 : f32
    %23 = vector.broadcast %cst_17 : f32 to vector<3x128xf32>
    %24 = arith.maximumf %22, %23 : vector<3x128xf32>
    %c0_18 = arith.constant 0 : index
    %c0_19 = arith.constant 0 : index
    %25 = vector.load %arg8[%c0_18, %c0_19] : memref<3x128xf32, #tpu.memory_space<vmem>>, vector<3x128xf32>
    tpu.vector_store %arg8[%c0_18, %c0_19], %24 {strides = array<i32>} : memref<3x128xf32, #tpu.memory_space<vmem>>, vector<3x128xf32>,
    return
  }
  func.func @transform_0(%arg0: i32) -> (i32, i32) {
    %c0_i32 = arith.constant 0 : i32
    %c0_i32_0 = arith.constant 0 : i32
    return %arg0, %c0_i32 : i32, i32
  }
  func.func @transform_1(%arg0: i32) -> (i32, i32) {
    %c0_i32 = arith.constant 0 : i32
    %c0_i32_0 = arith.constant 0 : i32
    %c0_i32_1 = arith.constant 0 : i32
    return %c0_i32, %c0_i32_0 : i32, i32
  }
  func.func @transform_2(%arg0: i32) -> (i32, i32) {
    %c0_i32 = arith.constant 0 : i32
    %c0_i32_0 = arith.constant 0 : i32
    %c0_i32_1 = arith.constant 0 : i32
    return %c0_i32, %c0_i32_0 : i32, i32
  }
  func.func @transform_3(%arg0: i32) -> (i32, i32) {
    %c0_i32 = arith.constant 0 : i32
    %c0_i32_0 = arith.constant 0 : i32
    %c0_i32_1 = arith.constant 0 : i32
    return %c0_i32, %c0_i32_0 : i32, i32
  }
  func.func @transform_4(%arg0: i32) -> (i32, i32) {
    %c0_i32 = arith.constant 0 : i32
    %c0_i32_0 = arith.constant 0 : i32
    %c0_i32_1 = arith.constant 0 : i32
    return %c0_i32, %c0_i32_0 : i32, i32
  }
  func.func @transform_5(%arg0: i32) -> (i32, i32) {
    %c0_i32 = arith.constant 0 : i32
    %c0_i32_0 = arith.constant 0 : i32
    %c0_i32_1 = arith.constant 0 : i32
    return %c0_i32, %c0_i32_0 : i32, i32
  }
  func.func @transform_6(%arg0: i32) -> (i32, i32) {
    %c0_i32 = arith.constant 0 : i32
    %c0_i32_0 = arith.constant 0 : i32
    %c0_i32_1 = arith.constant 0 : i32
    return %c0_i32, %c0_i32_0 : i32, i32
  }
  func.func @transform_7(%arg0: i32) -> (i32, i32) {
    %c0_i32 = arith.constant 0 : i32
    %c0_i32_0 = arith.constant 0 : i32
    return %c0_i32, %arg0 : i32, i32
  }
}

</mosaic_0001>

<bundles_post_ra>
// kernel: tpu_custom_call.1
= control target key start
LH: loop header
LB: loop body
LE: loop exit
PB: predicated region body
PF: predicated region fallthrough
CT: control target
= control target key end

     0   :  { %vm208_vm0 = vcmask 1044480   ;;  %vm209_vm1 = vcmask 1045504   ;;  %v661_v5 = vmov 65535   ;;  %s907_s0 = inlined_call_operand.vmem [shape: f32[128,203], index: 0, kind: input, shape index: {}]   ;;  %s908_s1 = inlined_call_operand.vmem [shape: bf16[203,128], index: 1, kind: input, shape index: {}]   ;;  %s909_s2 = inlined_call_operand.vmem [shape: f32[1,128], index: 2, kind: input, shape index: {}]   ;;  %s910_s3 = inlined_call_operand.vmem [shape: bf16[128,128], index: 3, kind: input, shape index: {}]   ;;  %s911_s4 = inlined_call_operand.vmem [shape: f32[1,128], index: 4, kind: input, shape index: {}]   ;;  %s912_s5 = inlined_call_operand.vmem [shape: bf16[3,128], index: 5, kind: input, shape index: {}]   ;;  %s913_s6 = inlined_call_operand.vmem [shape: f32[3,1], index: 6, kind: input, shape index: {}]   ;;  %s914_s7 = inlined_call_operand.hbm [shape: f32[3,128], index: 7, kind: output, shape index: {}]  }
   0x1   :  { %v615_v0 = vld [vmem:[%s908_s1 + $0x38] sm:$0xff]  ;;  %v566_v1 = vld [vmem:[%s908_s1 + $0x60] sm:$0xf]  ;;  %v620_v2 = vld [vmem:[%s908_s1 + $0x60] sm:$0x30]  ;;  %v210_v6 = vsel %vm208_vm0, 4294967295, %v661_v5 }
   0x2   :  { %215 = vmatpush.bf16.msra.mxu0 %v615_v0  ;;  %v614_v3 = vld [vmem:[%s908_s1 + $0x30] sm:$0xff]  ;;  %v567_v4 = vor.u32 %v620_v2, %v566_v1  ;;  %v211_v7 = vsel %vm209_vm1, %v210_v6, 0  ;;  %v613_v9 = vld [vmem:[%s908_s1 + $0x28] sm:$0xff]  ;;  %v619_v10 = vld [vmem:[%s908_s1 + $0x58] sm:$0xff] }
   0x4   :  { %v213_v8 = vand.u32 %v567_v4, %v211_v7 }
   0x6   :  { %216 = vmatpush.bf16.msra.mxu0 %v614_v3  ;;  %267 = vmatpush.bf16.msra.mxu1 %v213_v8 }
   0x7   :  { %12 = vsyncpa [#allocation3], 0  ;;  %v612_v11 = vld [vmem:[%s908_s1 + $0x20] sm:$0xff]  ;;  %v618_v12 = vld [vmem:[%s908_s1 + $0x50] sm:$0xff]  ;;  %vm183_vm2 = vcmask 613376  }
   0x8   :  { %v611_v13 = vld [vmem:[%s908_s1 + $0x18] sm:$0xff]  ;;  %v617_v14 = vld [vmem:[%s908_s1 + $0x48] sm:$0xff]  ;;  %v610_v15 = vld [vmem:[%s908_s1 + $0x10] sm:$0xff] }
   0x9   :  { %v616_v16 = vld [vmem:[%s908_s1 + $0x40] sm:$0xff]  ;;  %v29_v17 = vld [vmem:[%s907_s0 + $0x8] sm:$0xff]  ;;  %v31_v18 = vld [vmem:[%s907_s0 + $0x18] sm:$0xff] }
   0xa   :  { %217 = vmatpush.bf16.msra.mxu0 %v613_v9  ;;  %268 = vmatpush.bf16.msra.mxu1 %v619_v10  ;;  %v61_v19 = vpack.c.bf16 %v31_v18, %v29_v17  ;;  %v609_v20 = vld [vmem:[%s908_s1 + $0x8] sm:$0xff]  ;;  %v608_v21 = vld [vmem:[%s908_s1] sm:$0xff]  ;;  %v30_v23 = vld [vmem:[%s907_s0 + $0x10] sm:$0xff]  ;;  %s663_s1 = smov [#allocation2]  }
   0xb   :  { %v28_v22 = vld [vmem:[%s907_s0] sm:$0xff]  ;;  %v33_v25 = vld [vmem:[%s907_s0 + $0x28] sm:$0xff]  ;;  %v35_v26 = vld [vmem:[%s907_s0 + $0x38] sm:$0xff]  ;;  %s505_s18 = sshll.u32 %s663_s1, 4  ;;  %s506_s18 = int_to_ptr.vmem [resolvable:$true] %s505_s18 }
   0xc   :  { %v60_v24 = vpack.c.bf16 %v30_v23, %v28_v22  ;;  %v63_v27 = vpack.c.bf16 %v35_v26, %v33_v25  ;;  %v32_v28 = vld [vmem:[%s907_s0 + $0x20] sm:$0xff]  ;;  %v34_v29 = vld [vmem:[%s907_s0 + $0x30] sm:$0xff]  ;;  %v37_v31 = vld [vmem:[%s907_s0 + $0x48] sm:$0xff] }
   0xd   :  { %v62_v30 = vpack.c.bf16 %v34_v29, %v32_v28  ;;  %v39_v32 = vld [vmem:[%s907_s0 + $0x58] sm:$0xff]  ;;  %v36_v34 = vld [vmem:[%s907_s0 + $0x40] sm:$0xff]  ;;  %v38_v35 = vld [vmem:[%s907_s0 + $0x50] sm:$0xff] }
   0xe   :  { %218 = vmatpush.bf16.msra.mxu0 %v612_v11  ;;  %269 = vmatpush.bf16.msra.mxu1 %v618_v12  ;;  %v65_v33 = vpack.c.bf16 %v39_v32, %v37_v31  ;;  %v64_v36 = vpack.c.bf16 %v38_v35, %v36_v34  ;;  %v41_v37 = vld [vmem:[%s907_s0 + $0x68] sm:$0xff]  ;;  %v43_v38 = vld [vmem:[%s907_s0 + $0x78] sm:$0xff]  ;;  %v40_v40 = vld [vmem:[%s907_s0 + $0x60] sm:$0xff] }
   0xf   :  { %v67_v39 = vpack.c.bf16 %v43_v38, %v41_v37  ;;  %v42_v41 = vld [vmem:[%s907_s0 + $0x70] sm:$0xff]  ;;  %v45_v43 = vld [vmem:[%s907_s0 + $0x88] sm:$0xff]  ;;  %v47_v44 = vld [vmem:[%s907_s0 + $0x98] sm:$0xff] }
  0x10   :  { %v66_v42 = vpack.c.bf16 %v42_v41, %v40_v40  ;;  %v69_v45 = vpack.c.bf16 %v47_v44, %v45_v43  ;;  %v44_v46 = vld [vmem:[%s907_s0 + $0x80] sm:$0xff]  ;;  %v46_v47 = vld [vmem:[%s907_s0 + $0x90] sm:$0xff]  ;;  %v49_v49 = vld [vmem:[%s907_s0 + $0xa8] sm:$0xff] }
  0x11   :  { %v68_v48 = vpack.c.bf16 %v46_v47, %v44_v46  ;;  %v51_v50 = vld [vmem:[%s907_s0 + $0xb8] sm:$0xff]  ;;  %v48_v53 = vld [vmem:[%s907_s0 + $0xa0] sm:$0xff]  ;;  %v50_v54 = vld [vmem:[%s907_s0 + $0xb0] sm:$0xff] }
  0x12   :  { %219 = vmatpush.bf16.msra.mxu0 %v611_v13  ;;  %270 = vmatpush.bf16.msra.mxu1 %v617_v14  ;;  %v71_v51 = vpack.c.bf16 %v51_v50, %v49_v49  ;;  %v628_v52 = vld [vmem:[%s910_s3 + $0x38] sm:$0xff]  ;;  %v70_v55 = vpack.c.bf16 %v50_v54, %v48_v53  ;;  %v627_v56 = vld [vmem:[%s910_s3 + $0x30] sm:$0xff]  ;;  %v53_v57 = vld [vmem:[%s907_s0 + $0xc8] sm:$0xff] }
  0x13   :  { %405 = vmatpush.bf16.msra.mxu2 %v628_v52  ;;  %v55_v58 = vld [vmem:[%s907_s0 + $0xd8] sm:$0xff]  ;;  %v626_v60 = vld [vmem:[%s910_s3 + $0x28] sm:$0xff]  ;;  %v625_v61 = vld [vmem:[%s910_s3 + $0x20] sm:$0xff] }
  0x14   :  { %v73_v59 = vpack.c.bf16 %v55_v58, %v53_v57  ;;  %v52_v62 = vld [vmem:[%s907_s0 + $0xc0] sm:$0xff]  ;;  %v54_v63 = vld [vmem:[%s907_s0 + $0xd0] sm:$0xff]  ;;  %v624_v1 = vld [vmem:[%s910_s3 + $0x18] sm:$0xff] }
  0x15   :  { %v72_v0 = vpack.c.bf16 %v54_v63, %v52_v62  ;;  %v57_v2 = vld [vmem:[%s907_s0 + $0xe8] sm:$0xff]  ;;  %v59_v3 = vld [vmem:[%s907_s0 + $0xf8] sm:$0xff]  ;;  %v623_v4 = vld [vmem:[%s910_s3 + $0x10] sm:$0xff] }
  0x16   :  { %220 = vmatpush.bf16.msra.mxu0 %v610_v15  ;;  %271 = vmatpush.bf16.msra.mxu1 %v616_v16  ;;  %v75_v5 = vpack.c.bf16 %v59_v3, %v57_v2  ;;  %v622_v6 = vld [vmem:[%s910_s3 + $0x8] sm:$0xff]  ;;  %v56_v7 = vld [vmem:[%s907_s0 + $0xe0] sm:$0xff]  ;;  %v58_v8 = vld [vmem:[%s907_s0 + $0xf0] sm:$0xff] }
  0x17   :  { %406 = vmatpush.bf16.msra.mxu2 %v627_v56  ;;  %v621_v9 = vld [vmem:[%s910_s3] sm:$0xff]  ;;  %v74_v10 = vpack.c.bf16 %v58_v8, %v56_v7 }
  0x18   :  { %v877_v14 = vld [vmem:[%s909_s2] ss:$0 sm:$0xff] }
  0x19   :  { %568 = vmatmul.msk.bf16.vlgmr.msra.gmra.mxu1 %vm183_vm2, %v61_v19 }
  0x1a   :  { %221 = vmatpush.bf16.msra.mxu0 %v609_v20 }
  0x1b   :  { %407 = vmatpush.bf16.msra.mxu2 %v626_v60 }
  0x1e   :  { %222 = vmatpush.bf16.msra.mxu0 %v608_v21 }
  0x1f   :  { %408 = vmatpush.bf16.msra.mxu2 %v625_v61 }
  0x21   :  { %223 = vmatmul.bf16.vlgmr.msra.gmra.mxu0 %v60_v24 }
  0x23   :  { %409 = vmatpush.bf16.msra.mxu2 %v624_v1 }
  0x27   :  { %410 = vmatpush.bf16.msra.mxu2 %v623_v4 }
  0x29   :  { %569 = vmatmul.msk.bf16.gmra.mxu1 %vm183_vm2, %v63_v27 }
  0x2b   :  { %411 = vmatpush.bf16.msra.mxu2 %v622_v6 }
  0x2f   :  { %412 = vmatpush.bf16.msra.mxu2 %v621_v9 }
  0x31   :  { %228 = vmatmul.bf16.gmra.mxu0 %v62_v30 }
  0x39   :  { %570 = vmatmul.msk.bf16.gmra.mxu1 %vm183_vm2, %v65_v33 }
  0x41   :  { %233 = vmatmul.bf16.gmra.mxu0 %v64_v36 }
  0x49   :  { %571 = vmatmul.msk.bf16.gmra.mxu1 %vm183_vm2, %v67_v39 }
  0x51   :  { %238 = vmatmul.bf16.gmra.mxu0 %v66_v42 }
  0x59   :  { %572 = vmatmul.msk.bf16.gmra.mxu1 %vm183_vm2, %v69_v45 }
  0x61   :  { %243 = vmatmul.bf16.gmra.mxu0 %v68_v48 }
  0x69   :  { %573 = vmatmul.msk.bf16.gmra.mxu1 %vm183_vm2, %v71_v51 }
  0x71   :  { %248 = vmatmul.bf16.gmra.mxu0 %v70_v55 }
  0x79   :  { %574 = vmatmul.msk.bf16.gmra.mxu1 %vm183_vm2, %v73_v59 }
  0x81   :  { %253 = vmatmul.bf16.gmra.mxu0 %v72_v0 }
  0x89   :  { %575 = vmatmul.msk.bf16.gmra.mxu1 %vm183_vm2, %v75_v5 }
  0x91   :  { %258 = vmatmul.bf16.gmra.mxu0 %v74_v10 }
  0x96   :  { %v273_v11 = vpop.f32.mrf.mxu1 }
  0x9e   :  { %v224_v12 = vpop.f32.mrf.mxu0  ;;  %v275_v13 = vpop.f32.mrf.mxu1 }
  0x9f   :  { %v225_v15 = vadd.f32 %v877_v14, %v224_v12 }
  0xa1   :  { %v274_v18 = vadd.f32 %v273_v11, %v225_v15 }
  0xa3   :  { %v313_v21 = vmax.f32 %v274_v18, 0.0 }
  0xa6   :  { %v226_v16 = vpop.f32.mrf.mxu0  ;;  %v278_v17 = vpop.f32.mrf.mxu1 }
  0xa7   :  { %v227_v19 = vadd.f32 %v877_v14, %v226_v16 }
  0xa9   :  { %v276_v20 = vadd.f32 %v275_v13, %v227_v19 }
  0xab   :  { %v314_v22 = vmax.f32 %v276_v20, 0.0 }
  0xad   :  { %v329_v23 = vpack.c.bf16 %v314_v22, %v313_v21 }
  0xae   :  { %v229_v24 = vpop.f32.mrf.mxu0  ;;  %v280_v25 = vpop.f32.mrf.mxu1 }
  0xaf   :  { %413 = vmatmul.bf16.vlgmr.msra.gmra.mxu2 %v329_v23  ;;  %v230_v26 = vadd.f32 %v877_v14, %v229_v24 }
  0xb1   :  { %v279_v29 = vadd.f32 %v278_v17, %v230_v26 }
  0xb3   :  { %v315_v32 = vmax.f32 %v279_v29, 0.0 }
  0xb6   :  { %v231_v27 = vpop.f32.mrf.mxu0  ;;  %v283_v28 = vpop.f32.mrf.mxu1 }
  0xb7   :  { %v232_v30 = vadd.f32 %v877_v14, %v231_v27 }
  0xb9   :  { %v281_v31 = vadd.f32 %v280_v25, %v232_v30 }
  0xbb   :  { %v316_v33 = vmax.f32 %v281_v31, 0.0 }
  0xbd   :  { %v330_v34 = vpack.c.bf16 %v316_v33, %v315_v32 }
  0xbe   :  { %v234_v35 = vpop.f32.mrf.mxu0  ;;  %v285_v36 = vpop.f32.mrf.mxu1 }
  0xbf   :  { %418 = vmatmul.bf16.gmra.mxu2 %v330_v34  ;;  %v235_v37 = vadd.f32 %v877_v14, %v234_v35 }
  0xc1   :  { %v284_v40 = vadd.f32 %v283_v28, %v235_v37 }
  0xc3   :  { %v317_v43 = vmax.f32 %v284_v40, 0.0 }
  0xc6   :  { %v236_v38 = vpop.f32.mrf.mxu0  ;;  %v288_v39 = vpop.f32.mrf.mxu1 }
  0xc7   :  { %v237_v41 = vadd.f32 %v877_v14, %v236_v38  ;;  %v634_v38 = vld [vmem:[%s911_s4] ss:$0 sm:$0xff] }
  0xc9   :  { %v286_v42 = vadd.f32 %v285_v36, %v237_v41 }
  0xcb   :  { %v318_v44 = vmax.f32 %v286_v42, 0.0 }
  0xcd   :  { %v331_v45 = vpack.c.bf16 %v318_v44, %v317_v43 }
  0xce   :  { %v239_v46 = vpop.f32.mrf.mxu0  ;;  %v290_v47 = vpop.f32.mrf.mxu1 }
  0xcf   :  { %423 = vmatmul.bf16.gmra.mxu2 %v331_v45  ;;  %v240_v48 = vadd.f32 %v877_v14, %v239_v46 }
  0xd1   :  { %v289_v51 = vadd.f32 %v288_v39, %v240_v48 }
  0xd3   :  { %v319_v54 = vmax.f32 %v289_v51, 0.0 }
  0xd6   :  { %v241_v49 = vpop.f32.mrf.mxu0  ;;  %v293_v50 = vpop.f32.mrf.mxu1 }
  0xd7   :  { %v242_v52 = vadd.f32 %v877_v14, %v241_v49 }
  0xd9   :  { %v291_v53 = vadd.f32 %v290_v47, %v242_v52 }
  0xdb   :  { %v320_v55 = vmax.f32 %v291_v53, 0.0 }
  0xdd   :  { %v332_v56 = vpack.c.bf16 %v320_v55, %v319_v54 }
  0xde   :  { %v244_v57 = vpop.f32.mrf.mxu0  ;;  %v295_v58 = vpop.f32.mrf.mxu1 }
  0xdf   :  { %428 = vmatmul.bf16.gmra.mxu2 %v332_v56  ;;  %v245_v59 = vadd.f32 %v877_v14, %v244_v57 }
  0xe1   :  { %v294_v62 = vadd.f32 %v293_v50, %v245_v59 }
  0xe3   :  { %v321_v1 = vmax.f32 %v294_v62, 0.0 }
  0xe6   :  { %v246_v60 = vpop.f32.mrf.mxu0  ;;  %v298_v61 = vpop.f32.mrf.mxu1 }
  0xe7   :  { %v247_v63 = vadd.f32 %v877_v14, %v246_v60 }
  0xe9   :  { %v296_v0 = vadd.f32 %v295_v58, %v247_v63 }
  0xeb   :  { %v322_v2 = vmax.f32 %v296_v0, 0.0 }
  0xed   :  { %v333_v3 = vpack.c.bf16 %v322_v2, %v321_v1 }
  0xee   :  { %v249_v4 = vpop.f32.mrf.mxu0  ;;  %v300_v5 = vpop.f32.mrf.mxu1 }
  0xef   :  { %433 = vmatmul.bf16.gmra.mxu2 %v333_v3  ;;  %v250_v6 = vadd.f32 %v877_v14, %v249_v4 }
  0xf1   :  { %v299_v8 = vadd.f32 %v298_v61, %v250_v6 }
  0xf3   :  { %v323_v12 = vmax.f32 %v299_v8, 0.0 }
  0xf6   :  { %v251_v7 = vpop.f32.mrf.mxu0  ;;  %v303_v11 = vpop.f32.mrf.mxu1 }
  0xf7   :  { %v252_v9 = vadd.f32 %v877_v14, %v251_v7 }
  0xf9   :  { %v301_v10 = vadd.f32 %v300_v5, %v252_v9 }
  0xfb   :  { %v324_v13 = vmax.f32 %v301_v10, 0.0 }
  0xfd   :  { %v334_v15 = vpack.c.bf16 %v324_v13, %v323_v12 }
  0xfe   :  { %v254_v16 = vpop.f32.mrf.mxu0  ;;  %v305_v18 = vpop.f32.mrf.mxu1 }
  0xff   :  { %438 = vmatmul.bf16.gmra.mxu2 %v334_v15  ;;  %v255_v17 = vadd.f32 %v877_v14, %v254_v16 }
 0x101   :  { %v304_v20 = vadd.f32 %v303_v11, %v255_v17 }
 0x103   :  { %v325_v23 = vmax.f32 %v304_v20, 0.0 }
 0x106   :  { %v256_v19 = vpop.f32.mrf.mxu0  ;;  %v308_v26 = vpop.f32.mrf.mxu1 }
 0x107   :  { %v257_v21 = vadd.f32 %v877_v14, %v256_v19 }
 0x109   :  { %v306_v22 = vadd.f32 %v305_v18, %v257_v21 }
 0x10b   :  { %v326_v24 = vmax.f32 %v306_v22, 0.0 }
 0x10d   :  { %v335_v25 = vpack.c.bf16 %v326_v24, %v325_v23 }
 0x10e   :  { %v259_v27 = vpop.f32.mrf.mxu0  ;;  %v310_v32 = vpop.f32.mrf.mxu1 }
 0x10f   :  { %443 = vmatmul.bf16.gmra.mxu2 %v335_v25  ;;  %v260_v28 = vadd.f32 %v877_v14, %v259_v27 }
 0x111   :  { %v309_v30 = vadd.f32 %v308_v26, %v260_v28 }
 0x113   :  { %v327_v34 = vmax.f32 %v309_v30, 0.0  ;;  %v479_v30 = vld [vmem:[%s913_s6] sm:$0x7]  ;;  %s507_s6 = sshll.u32 %s914_s7, 4  ;;  %s508_s6 = int_to_ptr.hbm [resolvable:$true] %s507_s6 }
 0x116   :  { %v261_v29 = vpop.f32.mrf.mxu0 }
 0x117   :  { %v262_v31 = vadd.f32 %v877_v14, %v261_v29 }
 0x119   :  { %v311_v33 = vadd.f32 %v310_v32, %v262_v31  ;;  %v662_v31 = vmov 0   ;;  %v470_v32 = vld [vmem:[%s912_s5] sm:$0x3] }
 0x11a   :  { %632 = vset.pattern.permute.xlu0 %v662_v31 }
 0x11b   :  { %v328_v35 = vmax.f32 %v311_v33, 0.0  ;;  %482 = vperm.xlu0 %632, %v479_v30  }
 0x11d   :  { %v336_v36 = vpack.c.bf16 %v328_v35, %v327_v34 }
 0x11f   :  { %448 = vmatmul.bf16.gmra.mxu2 %v336_v36 }
 0x132   :  { %v414_v37 = vpop.f32.mrf.mxu2 }
 0x133   :  { %v415_v39 = vadd.f32 %v634_v38, %v414_v37 }
 0x135   :  { %v454_v42 = vmax.f32 %v415_v39, 0.0 }
 0x13a   :  { %v416_v40 = vpop.f32.mrf.mxu2 }
 0x13b   :  { %v417_v41 = vadd.f32 %v634_v38, %v416_v40 }
 0x13d   :  { %v455_v43 = vmax.f32 %v417_v41, 0.0 }
 0x13f   :  { %v471_v44 = vpack.c.bf16 %v455_v43, %v454_v42 }
 0x142   :  { %v419_v45 = vpop.f32.mrf.mxu2 }
 0x143   :  { %v420_v46 = vadd.f32 %v634_v38, %v419_v45 }
 0x145   :  { %v456_v48 = vmax.f32 %v420_v46, 0.0 }
 0x14a   :  { %v421_v14 = vpop.f32.mrf.mxu2 }
 0x14b   :  { %v422_v47 = vadd.f32 %v634_v38, %v421_v14 }
 0x14d   :  { %v457_v49 = vmax.f32 %v422_v47, 0.0 }
 0x14f   :  { %v472_v50 = vpack.c.bf16 %v457_v49, %v456_v48 }
 0x152   :  { %v424_v51 = vpop.f32.mrf.mxu2 }
 0x153   :  { %v425_v52 = vadd.f32 %v634_v38, %v424_v51 }
 0x155   :  { %v458_v55 = vmax.f32 %v425_v52, 0.0 }
 0x15a   :  { %v426_v53 = vpop.f32.mrf.mxu2 }
 0x15b   :  { %v427_v54 = vadd.f32 %v634_v38, %v426_v53 }
 0x15d   :  { %v459_v56 = vmax.f32 %v427_v54, 0.0 }
 0x15f   :  { %v473_v57 = vpack.c.bf16 %v459_v56, %v458_v55 }
 0x162   :  { %v429_v58 = vpop.f32.mrf.mxu2 }
 0x163   :  { %v430_v59 = vadd.f32 %v634_v38, %v429_v58 }
 0x165   :  { %v460_v62 = vmax.f32 %v430_v59, 0.0 }
 0x16a   :  { %v431_v60 = vpop.f32.mrf.mxu2 }
 0x16b   :  { %v432_v61 = vadd.f32 %v634_v38, %v431_v60 }
 0x16d   :  { %v461_v63 = vmax.f32 %v432_v61, 0.0 }
 0x16f   :  { %v474_v0 = vpack.c.bf16 %v461_v63, %v460_v62 }
 0x172   :  { %v434_v1 = vpop.f32.mrf.mxu2 }
 0x173   :  { %v435_v2 = vadd.f32 %v634_v38, %v434_v1 }
 0x175   :  { %v462_v5 = vmax.f32 %v435_v2, 0.0 }
 0x17a   :  { %v436_v3 = vpop.f32.mrf.mxu2 }
 0x17b   :  { %v437_v4 = vadd.f32 %v634_v38, %v436_v3 }
 0x17d   :  { %v463_v6 = vmax.f32 %v437_v4, 0.0 }
 0x17f   :  { %v475_v7 = vpack.c.bf16 %v463_v6, %v462_v5 }
 0x182   :  { %v439_v8 = vpop.f32.mrf.mxu2 }
 0x183   :  { %v440_v26 = vadd.f32 %v634_v38, %v439_v8 }
 0x185   :  { %v464_v28 = vmax.f32 %v440_v26, 0.0 }
 0x18a   :  { %v441_v9 = vpop.f32.mrf.mxu2 }
 0x18b   :  { %v442_v24 = vadd.f32 %v634_v38, %v441_v9 }
 0x18d   :  { %v465_v27 = vmax.f32 %v442_v24, 0.0  ;;  %v483_v33 = vpop.permute.xlu0 %482 }
 0x18f   :  { %v476_v29 = vpack.c.bf16 %v465_v27, %v464_v28 }
 0x192   :  { %v444_v10 = vpop.f32.mrf.mxu2 }
 0x193   :  { %v445_v21 = vadd.f32 %v634_v38, %v444_v10 }
 0x195   :  { %v466_v23 = vmax.f32 %v445_v21, 0.0 }
 0x19a   :  { %v446_v11 = vpop.f32.mrf.mxu2 }
 0x19b   :  { %v447_v19 = vadd.f32 %v634_v38, %v446_v11 }
 0x19d   :  { %v467_v22 = vmax.f32 %v447_v19, 0.0 }
 0x19f   :  { %v477_v25 = vpack.c.bf16 %v467_v22, %v466_v23 }
 0x1a2   :  { %v449_v12 = vpop.f32.mrf.mxu2 }
 0x1a3   :  { %v450_v13 = vadd.f32 %v634_v38, %v449_v12 }
 0x1a5   :  { %v468_v17 = vmax.f32 %v450_v13, 0.0 }
 0x1aa   :  { %v451_v15 = vpop.f32.mrf.mxu2 }
 0x1ab   :  { %v452_v16 = vadd.f32 %v634_v38, %v451_v15 }
 0x1ad   :  { %v469_v18 = vmax.f32 %v452_v16, 0.0 }
 0x1af   :  { %v478_v20 = vpack.c.bf16 %v469_v18, %v468_v17 }
 0x1b1   :  { %485 = vmatpush.bf16.xpose.msra.mxu3 %v478_v20 }
 0x1b9   :  { %486 = vmatpush.bf16.xpose.msra.mxu3 %v477_v25 }
 0x1c1   :  { %487 = vmatpush.bf16.xpose.msra.mxu3 %v476_v29 }
 0x1c9   :  { %488 = vmatpush.bf16.xpose.msra.mxu3 %v475_v7 }
 0x1d1   :  { %489 = vmatpush.bf16.xpose.msra.mxu3 %v474_v0 }
 0x1d9   :  { %490 = vmatpush.bf16.xpose.msra.mxu3 %v473_v57 }
 0x1e1   :  { %491 = vmatpush.bf16.xpose.msra.mxu3 %v472_v50 }
 0x1e9   :  { %492 = vmatpush.bf16.xpose.msra.mxu3 %v471_v44 }
 0x1f0   :  { %493 = vmatmul.bf16.vlgmr.msra.gmra.mxu3 %v470_v32 }
 0x273   :  { %v494_v34 = vpop.f32.mrf.mxu3 }
 0x274   :  { %v495_v35 = vadd.f32 %v494_v34, %v483_v33 }
 0x276   :  { %v498_v36 = vmax.f32 %v495_v35, 0.0 }
 0x278   :  { %499 = vst [vmem:[#allocation2] sm:$0x7] %v498_v36 }
 0x279   :  { %510 = dma.vmem_to_hbm [thread:$0]  %s506_s18, 64, %s508_s6, [#allocation3]  }
 0x27b   :  { %v496_v37 = vpop.f32.mrf.mxu3 }
 0x27c   :  { %659 = dma.done.wait [#allocation3], 64  }
 0x27d   :  { %660 = vsyncadd [#allocation3], 4294967232 }
 0x27e   :  { %515 = vsyncpa [#allocation3], 1 }

</bundles_post_ra>
